<compile_context>
chip_gen: v6e
topology: v6e:2x2x1
jax: 0.10.0
libtpu: 0.0.40
codegen_flags: <defaults>
</compile_context>

<pallas_src>
import jax
import jax.numpy as jnp
from jax.experimental import pallas as pl
from jax.experimental.pallas import tpu as pltpu

_LANES = 128
# 3 live arrays (x, x_prev, out), each double-buffered by the Pallas pipeline
# -> 6 tiles resident.  12 MiB total stays under v5e's 16 MiB default scoped
# VMEM with headroom and is already on the flat part of the tile-size curve
# for v6e/v7x HBM bandwidth (2 MiB per f32 buffer).
_VMEM_BUDGET_BYTES = 12 << 20
_MIN_GRID_STEPS = 4            # keep work for both v7x TensorCores
_MIN_KERNEL_BYTES = 512 * 1024  # below this, plain jnp beats a standalone call


def _sublane_pack(dtype):
    # Sublane packing multiple: 8 for 32-bit, 16 for 16-bit, 32 for 8-bit.
    return max(8, 32 // jnp.dtype(dtype).itemsize)


def _round_up(n, m):
    return ((n + m - 1) // m) * m


def _shift_kernel(mu_ref, x_ref, xp_ref, o_ref):
    # mu is a single f32 scalar living in SMEM.
    mu = mu_ref[0]
    x = x_ref[...]
    xp = xp_ref[...]
    # xp + mu*(x - xp)  ==  mu*x + (1-mu)*xp  (one mul + two adds).
    # Math promotes to f32 via mu (safe on v5e's f32-only VPU); the kernel is
    # HBM-bound so the extra vreg width is off the critical path.
    o_ref[...] = (xp + mu * (x - xp)).astype(o_ref.dtype)


def _jnp_blend(mu, x, x_prev):
    """Plain-jnp fallback (small sizes / non-128-divisible sizes)."""
    mu = jnp.asarray(mu, jnp.float32)
    xf = x.astype(jnp.float32)
    xpf = x_prev.astype(jnp.float32)
    return (xpf + mu * (xf - xpf)).astype(x.dtype)


def shift_forward(mu, x, x_prev, *, tile_rows=None,
                  min_kernel_bytes=_MIN_KERNEL_BYTES):
    """Pallas forward for Shift.

    mu: scalar parameter (f32); x, x_prev: same-shape arrays (any layout,
    treated elementwise; x_prev may have a different dtype).  Returns an
    array with x's shape and dtype.
    """
    if x_prev is None:
        return x

    orig_shape = x.shape
    out_dtype = x.dtype
    total = x.size

    x_isz = jnp.dtype(x.dtype).itemsize
    xp_isz = jnp.dtype(x_prev.dtype).itemsize
    o_isz = jnp.dtype(out_dtype).itemsize

    pack = max(_sublane_pack(x.dtype), _sublane_pack(x_prev.dtype))
    rows = total // _LANES

    # Fallback to plain jnp when a standalone kernel cannot win:
    #  * tiny inputs (fixed pallas_call cost dominates),
    #  * non-128-divisible sizes (avoids pad/slice HBM copies),
    #  * fewer rows than the packed-dtype sublane minimum.
    if (total % _LANES != 0
            or rows < pack
            or total * x_isz < min_kernel_bytes):
        return _jnp_blend(mu, x, x_prev)

    # ravel/reshape of contiguous data is free (no copy); x_prev stays in its
    # native dtype -- the kernel handles promotion for free on the VPU.
    x2d = jnp.ravel(x).reshape(rows, _LANES)
    xp2d = jnp.ravel(x_prev).reshape(rows, _LANES)

    if tile_rows is None:
        bytes_per_row = 2 * _LANES * (x_isz + xp_isz + o_isz)  # double-buffered
        tile_rows = max(pack,
                        (_VMEM_BUDGET_BYTES // bytes_per_row) // pack * pack)

    # Clamp so the (parallel) grid keeps >= _MIN_GRID_STEPS steps when the
    # input allows it; round to the packed-sublane multiple.
    tr = max(pack,
             min(tile_rows, _round_up(pl.cdiv(rows, _MIN_GRID_STEPS), pack)))
    grid = (pl.cdiv(rows, tr),)  # partial last block masked by Pallas

    mu_arr = jnp.asarray(mu, dtype=jnp.float32).reshape(1)

    cost = pl.CostEstimate(
        flops=3 * total,  # sub + mul + add per element
        transcendentals=0,
        bytes_accessed=total * (x_isz + xp_isz + o_isz),
    )

    out = pl.pallas_call(
        _shift_kernel,
        out_shape=jax.ShapeDtypeStruct((rows, _LANES), out_dtype),
        grid_spec=pltpu.PrefetchScalarGridSpec(
            num_scalar_prefetch=0,
            grid=grid,
            in_specs=[
                pl.BlockSpec(memory_space=pltpu.SMEM),          # mu scalar
                pl.BlockSpec((tr, _LANES), lambda i: (i, 0)),   # x tile
                pl.BlockSpec((tr, _LANES), lambda i: (i, 0)),   # x_prev tile
            ],
            out_specs=pl.BlockSpec((tr, _LANES), lambda i: (i, 0)),
        ),
        compiler_params=pltpu.CompilerParams(
            dimension_semantics=("parallel",)),
        cost_estimate=cost,
    )(mu_arr, x2d, xp2d)

    return out.reshape(orig_shape)


if __name__ == "__main__":
    key = jax.random.PRNGKey(0)
    k1, k2, k3, k4 = jax.random.split(key, 4)

    mu = jnp.float32(0.5)  # matches nn.Parameter(torch.tensor(0.5))

    # --- main demo: small NCHW f32 inputs (forced through the kernel) -----
    B, C, H, W = 2, 4, 16, 16
    x = jax.random.normal(k1, (B, C, H, W), dtype=jnp.float32)
    x_prev = jax.random.normal(k2, (B, C, H, W), dtype=jnp.float32)

    out = jax.block_until_ready(shift_forward(mu, x, x_prev,
                                              min_kernel_bytes=0))
    ref = mu * x + (1.0 - mu) * x_prev
    assert out.shape == x.shape and out.dtype == x.dtype
    assert jnp.allclose(out, ref, atol=1e-5, rtol=1e-5)

    # x_prev is None path returns x unchanged.
    out_none = shift_forward(mu, x, None)
    assert jnp.array_equal(out_none, x)

    # --- bf16 path: native-dtype I/O, packed (16,128) sublane rounding ----
    xb = jax.random.normal(k3, (B, C, H, W), dtype=jnp.bfloat16)
    xpb = jax.random.normal(k4, (B, C, H, W), dtype=jnp.bfloat16)
    out_b = jax.block_until_ready(shift_forward(mu, xb, xpb,
                                                min_kernel_bytes=0))
    ref_b = (mu * xb.astype(jnp.float32)
             + (1.0 - mu) * xpb.astype(jnp.float32)).astype(jnp.bfloat16)
    assert out_b.dtype == jnp.bfloat16
    assert jnp.allclose(out_b.astype(jnp.float32), ref_b.astype(jnp.float32),
                        atol=2e-2, rtol=2e-2)

    # --- mixed-dtype x_prev: no eager wrapper cast, kernel promotes -------
    out_m = jax.block_until_ready(shift_forward(mu, x, xpb,
                                                min_kernel_bytes=0))
    ref_m = mu * x + (1.0 - mu) * xpb.astype(jnp.float32)
    assert out_m.dtype == x.dtype
    assert jnp.allclose(out_m, ref_m, atol=1e-5, rtol=1e-5)

    # --- default-threshold small input: plain-jnp fallback path -----------
    out_s = jax.block_until_ready(shift_forward(mu, x, x_prev))
    assert jnp.allclose(out_s, ref, atol=1e-5, rtol=1e-5)

    # --- non-128-divisible size: jnp fallback (no pad/slice HBM copies) ---
    xo = jax.random.normal(k1, (3, 5, 7, 9), dtype=jnp.float32)   # 945 elems
    xpo = jax.random.normal(k2, (3, 5, 7, 9), dtype=jnp.float32)
    out_o = jax.block_until_ready(shift_forward(mu, xo, xpo))
    ref_o = mu * xo + (1.0 - mu) * xpo
    assert out_o.shape == xo.shape
    assert jnp.allclose(out_o, ref_o, atol=1e-5, rtol=1e-5)

    # --- moderately larger input: kernel path via default threshold, grid>1
    xl = jax.random.normal(k3, (4, 8, 64, 64), dtype=jnp.float32)  # 512 KiB
    xpl = jax.random.normal(k4, (4, 8, 64, 64), dtype=jnp.float32)
    out_l = jax.block_until_ready(shift_forward(mu, xl, xpl))
    ref_l = mu * xl + (1.0 - mu) * xpl
    assert jnp.allclose(out_l, ref_l, atol=1e-5, rtol=1e-5)

    print("KERNEL_OK")
</pallas_src>

<mosaic_0001>
module attributes {stable_mosaic.version = 11 : i64} {
  func.func @_shift_kernel(%arg0: i32, %arg1: memref<1xf32, #tpu.memory_space<smem>>, %arg2: memref<8x128xf32, #tpu.memory_space<vmem>>, %arg3: memref<8x128xf32, #tpu.memory_space<vmem>>, %arg4: memref<8x128xf32, #tpu.memory_space<vmem>>) attributes {dimension_semantics = [#tpu.dimension_semantics<parallel>], iteration_bounds = array<i64: 2>, scalar_prefetch = 0 : i64, scratch_operands = 0 : i64, tpu.core_type = #tpu.core_type<tc>, window_params = [{transform_indices = @transform_0, window_bounds = array<i64: 1>}, {transform_indices = @transform_1, window_bounds = array<i64: 8, 128>}, {transform_indices = @transform_2, window_bounds = array<i64: 8, 128>}, {transform_indices = @transform_3, window_bounds = array<i64: 8, 128>}]} {
    %c0 = arith.constant 0 : index
    %0 = memref.load %arg1[%c0] : memref<1xf32, #tpu.memory_space<smem>>
    %c0_0 = arith.constant 0 : index
    %c0_1 = arith.constant 0 : index
    %1 = vector.load %arg2[%c0_0, %c0_1] : memref<8x128xf32, #tpu.memory_space<vmem>>, vector<8x128xf32>
    %c0_2 = arith.constant 0 : index
    %c0_3 = arith.constant 0 : index
    %2 = vector.load %arg3[%c0_2, %c0_3] : memref<8x128xf32, #tpu.memory_space<vmem>>, vector<8x128xf32>
    %3 = arith.subf %1, %2 : vector<8x128xf32>
    %4 = vector.broadcast %0 : f32 to vector<8x128xf32>
    %5 = arith.mulf %4, %3 : vector<8x128xf32>
    %6 = arith.addf %2, %5 : vector<8x128xf32>
    %c0_4 = arith.constant 0 : index
    %c0_5 = arith.constant 0 : index
    %7 = vector.load %arg4[%c0_4, %c0_5] : memref<8x128xf32, #tpu.memory_space<vmem>>, vector<8x128xf32>
    tpu.vector_store %arg4[%c0_4, %c0_5], %6 {strides = array<i32>} : memref<8x128xf32, #tpu.memory_space<vmem>>, vector<8x128xf32>,
    return
  }
  func.func @transform_0(%arg0: i32) -> i32 {
    %c0_i32 = arith.constant 0 : i32
    %c0_i32_0 = arith.constant 0 : i32
    return %c0_i32 : i32
  }
  func.func @transform_1(%arg0: i32) -> (i32, i32) {
    %c0_i32 = arith.constant 0 : i32
    %c0_i32_0 = arith.constant 0 : i32
    return %arg0, %c0_i32 : i32, i32
  }
  func.func @transform_2(%arg0: i32) -> (i32, i32) {
    %c0_i32 = arith.constant 0 : i32
    %c0_i32_0 = arith.constant 0 : i32
    return %arg0, %c0_i32 : i32, i32
  }
  func.func @transform_3(%arg0: i32) -> (i32, i32) {
    %c0_i32 = arith.constant 0 : i32
    %c0_i32_0 = arith.constant 0 : i32
    return %arg0, %c0_i32 : i32, i32
  }
}

</mosaic_0001>

<bundles_post_ra>
// kernel: tpu_custom_call.1
= control target key start
LH: loop header
LB: loop body
LE: loop exit
PB: predicated region body
PF: predicated region fallthrough
CT: control target
= control target key end

     0   :  { %s751_s0 = inlined_call_operand.<no memory space> [shape: f32[1], index: 0, kind: input, shape index: {}]   ;;  %s752_s1 = inlined_call_operand.hbm [shape: f32[16,128], index: 1, kind: input, shape index: {}]   ;;  %s753_s2 = inlined_call_operand.hbm [shape: f32[16,128], index: 2, kind: input, shape index: {}]   ;;  %s754_s3 = inlined_call_operand.hbm [shape: f32[16,128], index: 3, kind: output, shape index: {}]  }
   0x1   :  { %8 = sst [smem:[#allocation2]] %s751_s0 }
   0x2   :  { %9 = vsyncpa [#allocation4], 0 }
   0x3   :  { %11 = vsyncpa [#allocation4 + $0x1], 0 }
   0x4   :  { %12 = vsyncpa [#allocation7], 0 }
   0x5   :  { %14 = vsyncpa [#allocation7 + $0x1], 0 }
   0x6   :  { %15 = vsyncpa [#allocation5], 0 }
   0x7   :  { %17 = vsyncpa [#allocation5 + $0x1], 0  ;;  %s557_s14 = smov 0   ;;  %s559_s15 = smov 0  }
   0x8   :  { %s561_s16 = smov 0   ;;  %s563_s17 = smov 0  }
   0x9 LB: > { %s578_s0 = sadd.s32 4294967295, %s529_s17   ;;  %s339_s18 = sadd.s32 4294967294, %s529_s17   ;;  %s529_s17 = sphi %s563_s17, %s773_s17   ;;  %s525_s16 = sphi %s561_s16, %s772_s16   ;;  %s521_s15 = sphi %s559_s15, %s771_s15   ;;  %s517_s14 = sphi %s557_s14, %s770_s14  }
   0xa   : > { %s582_s19 = sadd.s32 1, %s529_s17   ;;  %s51_s20 = sadd.s32 1, %s525_s16 }
   0xb   : > { %s48_s21 = ssub.s32 %s529_s17, %s582_s19  ;;  %p58_p0 = scmp.ne.s32.totalorder %s525_s16, %s521_s15 }
   0xc   : > { %p49_p1 = scmp.eq.s32.totalorder %s48_s21, 0  ;;  %p59_p2 = scmp.eq.s32.totalorder %s529_s17, 0 }
   0xd   : > { %p64_p3 = scmp.ne.s32.totalorder %s521_s15, %s517_s14  ;;  %p65_p4 = scmp.eq.s32.totalorder %s578_s0, 0 }
   0xe   : > { %s594_s22 = scalar_select %p49_p1, %s525_s16, %s51_s20  }
   0xf   : > { %p596_p5 = por %p59_p2, %p58_p0  ;;  %p600_p6 = por %p65_p4, %p64_p3 }
  0x10   : > { %p114_p7 = scmp.eq.s32.totalorder %s578_s0, 1  ;;  %p120_p8 = scmp.eq.s32.totalorder %s339_s18, 1 }
  0x11   : > { %s758_s24 = scalar_select %p600_p6, 1, 0 }
  0x12   : > { %p371_p10 = scmp.lt.s32.totalorder %s529_s17, 2  ;;  %p607_p11 = por %p114_p7, %p58_p0 }
  0x13   : > { %p611_p12 = por %p120_p8, %p64_p3  ;;  %s616_s27 = sand.u32 1, %s525_s16  }
  0x14   : > { %s759_s25 = scalar_select %p607_p11, 1, 0 }
  0x15   : > { %s760_s26 = scalar_select %p611_p12, 1, 0 }
  0x16   : > { %s343_s28 = sshll.u32 %s529_s17, 7  ;;  %s342_s29 = sshll.u32 %s616_s27, 3 }
  0x17   : > { %s625_s5 = scalar_lea.hbm %s752_s1, %s343_s28  ;;  %s147_s6 = scalar_lea.vmem [#allocation3], %s342_s29 }
  0x18   : > { %s154_s7 = sshll.u32 %s147_s6, 4  ;;  %p631_p13 = pnand %p371_p10, %p596_p5  ;;  %s635_s7 = int_to_ptr.vmem [resolvable:$true] %s154_s7 }
  0x19   : > { %s144_s9 = scalar_lea.sflag [#allocation4], %s616_s27  ;;  %s405_s10 = scalar_lea.hbm %s625_s5, 128 }
  0x1a   : > { %p406_p2 = scmp.ne.s32.totalorder %s625_s5, %s405_s10  ;;  %p407_p3 = pneg %p631_p13 }
  0x1b   : > { %s410_s13 = scalar_lea.hbm %s752_s1, 256  ;;  %p411_p5 = scmp.lt.s32.totalorder %s625_s5, %s752_s1 }
  0x1c   : > { %p408_p4 = pnand %p407_p3, %p406_p2  ;;  %p412_p8 = scmp.lt.s32.totalorder %s410_s13, %s405_s10 }
  0x1e   : > { %p409_p7 = pneg %p408_p4  ;;  %p413_p10 = por %p412_p8, %p411_p5 }
  0x20   : > { %p414_p9 = pnand %p413_p10, %p409_p7 }
  0x22   : > { %417 = shalt.err (!%p414_p9)
}
  0x23   : > { %s418_s21 = scalar_lea.vmem %s635_s7, 128  ;;  %s531_s23 = smov [#allocation3]  }
  0x24   : > { %p419_p0 = scmp.ne.s32.totalorder %s635_s7, %s418_s21  ;;  %s423_s30 = sshll.u32 %s531_s23, 4  ;;  %s424_s30 = int_to_ptr.vmem [resolvable:$false] %s423_s30 }
  0x25   : > { %s425_s4 = scalar_lea.vmem %s424_s30, 256  ;;  %p426_p1 = scmp.lt.s32.totalorder %s635_s7, %s424_s30 }
  0x26   : > { %p421_p2 = pnand %p419_p0, %p407_p3  ;;  %p427_p12 = scmp.lt.s32.totalorder %s425_s4, %s418_s21 }
  0x28   : > { %p422_p4 = pneg %p421_p2  ;;  %p428_p11 = por %p427_p12, %p426_p1 }
  0x2a   : > { %p429_p5 = pnand %p428_p11, %p422_p4 }
  0x2c   : > { %432 = shalt.err (!%p429_p5)
}
  0x2d   : > { %363 = dma.hbm_to_vmem [thread:$0]  (!%p631_p13), %s625_s5, 128, %s635_s7, %s144_s9  }
  0x2e   : > { %p762_p9 = scmp.lt.s32.totalorder %s529_s17, 3  ;;  %p763_p0 = scmp.ge.s32.totalorder %s529_s17, 1 }
  0x2f   : > { %s677_s12 = scalar_lea.hbm %s753_s2, %s343_s28  ;;  %s165_s13 = scalar_lea.vmem [#allocation6], %s342_s29 }
  0x30   : > { %p668_p7 = pnand %p763_p0, %p762_p9  ;;  %s172_s18 = sshll.u32 %s165_s13, 4  ;;  %s173_s18 = int_to_ptr.vmem [resolvable:$true] %s172_s18 }
  0x31   : > { %s162_s5 = scalar_lea.sflag [#allocation7], %s616_s27  ;;  %s433_s7 = scalar_lea.hbm %s677_s12, 128 }
  0x32   : > { %s764_s6 = scalar_select %p668_p7, 1, 0 }
  0x33   : > { %p434_p11 = scmp.ne.s32.totalorder %s677_s12, %s433_s7  ;;  %s438_s21 = scalar_lea.hbm %s753_s2, 256 }
  0x34   : > { %p439_p8 = scmp.lt.s32.totalorder %s677_s12, %s753_s2  ;;  %p440_p10 = scmp.lt.s32.totalorder %s438_s21, %s433_s7 }
  0x35   : > { %p436_p12 = pnand %p434_p11, %p407_p3 }
  0x36   : > { %p441_p2 = por %p440_p10, %p439_p8 }
  0x37   : > { %p437_p1 = pneg %p436_p12 }
  0x39   : > { %p442_p4 = pnand %p441_p2, %p437_p1 }
  0x3b   : > { %445 = shalt.err (!%p442_p4)
}
  0x3c   : > { %s446_s29 = scalar_lea.vmem %s173_s18, 128  ;;  %s532_s27 = smov [#allocation6]  }
  0x3d   : > { %p447_p5 = scmp.ne.s32.totalorder %s173_s18, %s446_s29  ;;  %s451_s30 = sshll.u32 %s532_s27, 4  ;;  %s452_s30 = int_to_ptr.vmem [resolvable:$false] %s451_s30 }
  0x3e   : > { %s453_s4 = scalar_lea.vmem %s452_s30, 256  ;;  %p454_p11 = scmp.lt.s32.totalorder %s173_s18, %s452_s30 }
  0x3f   : > { %p449_p9 = pnand %p447_p5, %p407_p3  ;;  %p455_p12 = scmp.lt.s32.totalorder %s453_s4, %s446_s29 }
  0x41   : > { %p450_p0 = pneg %p449_p9  ;;  %p456_p6 = por %p455_p12, %p454_p11 }
  0x43   : > { %p457_p7 = pnand %p456_p6, %p450_p0 }
  0x45   : > { %460 = shalt.err (!%p457_p7)
}
  0x46   : > { %366 = dma.hbm_to_vmem [thread:$0]  (!%p631_p13), %s677_s12, 128, %s173_s18, %s162_s5  }
  0x47   : > { %p765_p1 = scmp.ne.s32.totalorder %s764_s6, 0 }
  0x48   : > { %s703_s10 = sand.u32 (!%p765_p1), 1, %s521_s15   ;;  %p766_p3 = scmp.ne.s32.totalorder (!%p765_p1), %s758_s24, 0 }
  0x49   : > { %181 = sbr.rel (%p765_p1) target bundleno = 106 (0x6a), region = 32  ;;  %s347_s11 = sshll.u32 (!%p765_p1), %s703_s10, 3 }
  0x4a   : > { %s184_s13 = scalar_lea.sflag (!%p765_p1), [#allocation4], %s703_s10  ;;  %s187_s7 = scalar_lea.vmem (!%p765_p1), [#allocation3], %s347_s11 }
  0x4e   : > { %504 = dma.done.wait (%p766_p3), %s184_s13, 128  }
  0x4f   : > { %506 = vsyncadd (%p766_p3), %s184_s13, 4294967168  ;;  %s193_s8 = scalar_lea.sflag [#allocation7], %s703_s10  ;;  %s196_s12 = scalar_lea.vmem [#allocation6], %s347_s11 }
  0x50   : > { %508 = dma.done.wait (%p766_p3), %s193_s8, 128  }
  0x51   : > { %510 = vsyncadd (%p766_p3), %s193_s8, 4294967168  ;;  %s224_s6 = sld [smem:[#allocation2]]  ;;  %v225_v0 = vld [vmem:[%s187_s7] sm:$0xff]  ;;  %v226_v1 = vld [vmem:[%s196_s12] sm:$0xff]  ;;  %s223_s18 = scalar_lea.vmem [#allocation8], %s347_s11 }
  0x52   : > { %v227_v3 = vsub.f32 %v225_v0, %v226_v1  ;;  %s246_s5 = sshll.u32 %s223_s18, 4  ;;  %s351_s9 = sshll.u32 %s578_s0, 7  ;;  %s247_s5 = int_to_ptr.vmem [resolvable:$true] %s246_s5 }
  0x53   : > { %s244_s28 = scalar_lea.hbm %s754_s3, %s351_s9  ;;  %s233_s24 = scalar_lea.sflag [#allocation5], %s703_s10 }
  0x54   : > { %s461_s23 = scalar_lea.vmem %s247_s5, 128  ;;  %p767_p13 = scmp.ne.s32.totalorder %s759_s25, 0 }
  0x55   : > { %p462_p6 = scmp.ne.s32.totalorder %s247_s5, %s461_s23  ;;  %s533_s29 = smov [#allocation8]  }
  0x56   : > { %s465_s27 = sshll.u32 %s533_s29, 4  ;;  %s466_s27 = int_to_ptr.vmem [resolvable:$false] %s465_s27 }
  0x57   : > { %v228_v2 = vstv %s224_s6  ;;  %p463_p7 = pnand %p462_p6, %p767_p13  ;;  %s467_s30 = scalar_lea.vmem %s466_s27, 256 }
  0x58   : > { %v229_v4 = vmul.f32 %v228_v2, %v227_v3  ;;  %p468_p10 = scmp.lt.s32.totalorder %s247_s5, %s466_s27  ;;  %p469_p2 = scmp.lt.s32.totalorder %s467_s30, %s461_s23 }
  0x59   : > { %p464_p8 = pneg %p463_p7 }
  0x5a   : > { %v230_v5 = vadd.f32 %v229_v4, %v226_v1  ;;  %p470_p4 = por %p469_p2, %p468_p10 }
  0x5c   : > { %231 = vst [vmem:[%s223_s18] sm:$0xff] %v230_v5  ;;  %p471_p5 = pnand %p470_p4, %p464_p8 }
  0x5e   : > { %474 = shalt.err (!%p471_p5)
}
  0x5f   : > { %s475_s0 = scalar_lea.hbm %s244_s28, 128  ;;  %s479_s11 = scalar_lea.hbm %s754_s3, 256 }
  0x60   : > { %p476_p9 = scmp.ne.s32.totalorder %s244_s28, %s475_s0  ;;  %p480_p12 = scmp.lt.s32.totalorder %s244_s28, %s754_s3 }
  0x61   : > { %p481_p1 = scmp.lt.s32.totalorder %s479_s11, %s475_s0 }
  0x62   : > { %p477_p0 = pnand %p476_p9, %p767_p13 }
  0x63   : > { %p482_p3 = por %p481_p1, %p480_p12 }
  0x64   : > { %p478_p11 = pneg %p477_p0 }
  0x66   : > { %p483_p6 = pnand %p482_p3, %p478_p11 }
  0x68   : > { %486 = shalt.err (!%p483_p6)
}
  0x69   : > { %358 = dma.vmem_to_hbm [thread:$0]  (%p767_p13), %s247_s5, 128, %s244_s28, %s233_s24  }
  0x6a PF: > { %s258_s8 = sand.u32 1, %s517_s14   ;;  %p768_p7 = scmp.ne.s32.totalorder %s760_s26, 0 }
  0x6b   : > { %p769_p8 = scmp.ge.s32.totalorder %s529_s17, 2  ;;  %s259_s12 = scalar_lea.sflag [#allocation5], %s258_s8 }
  0x6d   : > { %p368_p10 = pnand %p769_p8, %p768_p7 }
  0x6f   : > { %p369_p2 = pneg %p368_p10 }
  0x71   : > { %512 = dma.done.wait (%p369_p2), %s259_s12, 128  }
  0x72   : > { %514 = vsyncadd (%p369_p2), %s259_s12, 4294967168  ;;  %p20_p4 = scmp.ge.s32.totalorder %s582_s19, 4   ;;  %s770_s14 = smov %s521_s15 }
  0x73   : > { %s771_s15 = smov %s525_s16  ;;  %s772_s16 = smov %s594_s22 }
  0x74   : > { %s773_s17 = smov %s582_s19  ;;  %22 = sbr.rel (!%p20_p4) target bundleno = 9 (0x9), region = 90 }
  0x79   :  { %264 = vsyncpa [#allocation4], 1 }
  0x7a   :  { %266 = vsyncpa [#allocation4 + $0x1], 1 }
  0x7b   :  { %267 = vsyncpa [#allocation7], 1 }
  0x7c   :  { %269 = vsyncpa [#allocation7 + $0x1], 1 }
  0x7d   :  { %270 = vsyncpa [#allocation5], 1 }
  0x7e   :  { %272 = vsyncpa [#allocation5 + $0x1], 1 }

</bundles_post_ra>
